<compile_context>
chip_gen: v7x
topology: tpu7x:2x2x1
jax: 0.10.0
libtpu: 0.0.40
codegen_flags: <defaults>
</compile_context>

<pallas_src>
import jax
import jax.numpy as jnp
from jax import lax
from jax.experimental import pallas as pl
from jax.experimental.pallas import tpu as pltpu


def three_inputs_kernel(idx1_ref, idx2_ref, cat_ref,
                        tables_ref, wconv_ref, wc_ref, wi_ref, wo_ref, b_ref,
                        out_ref):
    B = cat_ref.shape[0]
    H = tables_ref.shape[1]
    V = tables_ref.shape[0]          # 2 * n_tokens (title table rows, then full)
    n_tok = V // 2

    def branch(idx_ref, tok_offset, w_stack, b_row):
        # idx_ref: (N, 1) int32 flattened token ids, N = B * T (row-major).
        N = idx_ref.shape[0]
        T = N // B
        idx = idx_ref[...]                                        # (N, 1)
        # Embedding gather as a one-hot matmul on the MXU (tables stay in VMEM).
        tok = lax.broadcasted_iota(jnp.int32, (N, V), 1)
        onehot = (tok == (idx + tok_offset)).astype(jnp.float32)  # (N, V)
        e = jnp.dot(onehot, tables_ref[...],
                    preferred_element_type=jnp.float32)           # (N, H)
        # im2col for kernel_size=2: row r pairs e[r] with e[r+1]
        # (the wrap-around / cross-batch rows are masked out by the pool matrix).
        e_next = jnp.concatenate([e[1:, :], e[0:1, :]], axis=0)   # (N, H)
        x2 = jnp.concatenate([e, e_next], axis=1)                 # (N, 2H)
        conv = jnp.dot(x2, w_stack,
                       preferred_element_type=jnp.float32) + b_row
        conv = jnp.maximum(conv, 0.0)                             # ReLU
        # AdaptiveAvgPool1d(1): mean over the T-1 valid conv positions per batch
        # row, expressed as a (B, N) pooling matmul (also masks invalid rows).
        col = lax.broadcasted_iota(jnp.int32, (B, N), 1)
        start = lax.broadcasted_iota(jnp.int32, (B, N), 0) * T
        pool = jnp.where((col >= start) & (col < start + (T - 1)),
                         jnp.float32(1.0 / (T - 1)), jnp.float32(0.0))
        return jnp.dot(pool, conv, preferred_element_type=jnp.float32)  # (B, H)

    # Static, sublane-aligned ref slices (2H = 64 is a multiple of 8).
    title = branch(idx1_ref, 0, wconv_ref[0:2 * H, :], b_ref[0:1, 0:H])
    full = branch(idx2_ref, n_tok, wconv_ref[2 * H:4 * H, :], b_ref[1:2, 0:H])

    category = (jnp.dot(cat_ref[...], wc_ref[...],
                        preferred_element_type=jnp.float32) + b_ref[2:3, 0:H])

    # concat([title | full | category]) -> single inter_dense matmul.
    feat = jnp.concatenate([title, full, category], axis=1)       # (B, 3H)
    pre = (jnp.dot(feat, wi_ref[...],
                   preferred_element_type=jnp.float32) + b_ref[3:4, 0:2 * H])
    out = (jnp.dot(pre, wo_ref[...],
                   preferred_element_type=jnp.float32) + b_ref[4:5, 0:1])
    out_ref[...] = out.astype(out_ref.dtype)                      # (B, 1)


def init_params(key, n_tokens, n_cat_features, hid_size):
    """Random params (PyTorch-equivalent shapes), packed once into few slabs."""
    ks = jax.random.split(key, 14)
    s = 0.1
    H = hid_size
    f32 = jnp.float32
    title_emb = jax.random.normal(ks[0], (n_tokens, H), f32) * s
    full_emb = jax.random.normal(ks[1], (n_tokens, H), f32) * s
    # Conv1d weight W[o, c, k] stored per-tap as (in=c, out=o) matrices.
    wt0 = jax.random.normal(ks[2], (H, H), f32) * s
    wt1 = jax.random.normal(ks[3], (H, H), f32) * s
    bt = jax.random.normal(ks[4], (H,), f32) * s
    wf0 = jax.random.normal(ks[5], (H, H), f32) * s
    wf1 = jax.random.normal(ks[6], (H, H), f32) * s
    bf = jax.random.normal(ks[7], (H,), f32) * s
    # Linear layers stored (in_features, out_features) (= PyTorch W.T).
    wc = jax.random.normal(ks[8], (n_cat_features, H), f32) * s
    bc = jax.random.normal(ks[9], (H,), f32) * s
    wi = jax.random.normal(ks[10], (3 * H, 2 * H), f32) * s
    bi = jax.random.normal(ks[11], (2 * H,), f32) * s
    wo = jax.random.normal(ks[12], (2 * H, 1), f32) * s
    bo = jax.random.normal(ks[13], (1,), f32) * s

    # --- pack (done once at init, not per call) ---
    emb_tables = jnp.concatenate([title_emb, full_emb], axis=0)   # (2*V, H)
    w_conv = jnp.concatenate([wt0, wt1, wf0, wf1], axis=0)        # (4H, H)
    bias_pack = jnp.zeros((5, 2 * H), f32)
    bias_pack = bias_pack.at[0, :H].set(bt)
    bias_pack = bias_pack.at[1, :H].set(bf)
    bias_pack = bias_pack.at[2, :H].set(bc)
    bias_pack = bias_pack.at[3, :2 * H].set(bi)
    bias_pack = bias_pack.at[4, 0].set(bo[0])
    return {"emb_tables": emb_tables, "w_conv": w_conv,
            "wc": wc, "wi": wi, "wo": wo, "bias": bias_pack}


def three_inputs_net(params, input1, input2, input3):
    B, T1 = input1.shape
    _, T2 = input2.shape
    assert T1 >= 2 and T2 >= 2, "Conv1d(kernel_size=2) needs sequence length >= 2"

    idx1 = input1.reshape(B * T1, 1).astype(jnp.int32)
    idx2 = input2.reshape(B * T2, 1).astype(jnp.int32)
    cat = input3.astype(jnp.float32)

    args = (idx1, idx2, cat,
            params["emb_tables"], params["w_conv"],
            params["wc"], params["wi"], params["wo"], params["bias"])

    vmem = pl.BlockSpec(memory_space=pltpu.MemorySpace.VMEM)
    # Grid-less: everything (ids + packed params) trivially fits VMEM at these
    # shapes. TODO(synk): for large B/T add a parallel batch grid + time-tile
    # accumulator (pl.when init/finalize) to restore pipelining on v7x (64 MiB).
    return pl.pallas_call(
        three_inputs_kernel,
        out_shape=jax.ShapeDtypeStruct((B, 1), jnp.float32),
        in_specs=[vmem] * len(args),
        out_specs=vmem,
    )(*args)


def reference_forward(params, input1, input2, input3, H, n_tokens):
    """Pure-JAX reference matching the PyTorch forward."""
    tables = params["emb_tables"]
    title_tab, full_tab = tables[:n_tokens], tables[n_tokens:]
    wt0 = params["w_conv"][0:H]
    wt1 = params["w_conv"][H:2 * H]
    wf0 = params["w_conv"][2 * H:3 * H]
    wf1 = params["w_conv"][3 * H:4 * H]
    b = params["bias"]
    bt, bf, bc = b[0, :H], b[1, :H], b[2, :H]
    bi, bo = b[3, :2 * H], b[4, 0]

    def branch(idx, tab, w0, w1, bias):
        e = tab[idx]                                              # (B, T, H)
        conv = (jnp.einsum("btc,co->bto", e[:, :-1], w0)
                + jnp.einsum("btc,co->bto", e[:, 1:], w1) + bias)
        return jnp.maximum(conv, 0.0).mean(axis=1)                # (B, H)

    title = branch(input1, title_tab, wt0, wt1, bt)
    full = branch(input2, full_tab, wf0, wf1, bf)
    category = input3.astype(jnp.float32) @ params["wc"] + bc
    feat = jnp.concatenate([title, full, category], axis=1)
    pre = feat @ params["wi"] + bi
    return pre @ params["wo"] + bo


if __name__ == "__main__":
    B, T1, T2 = 2, 8, 10
    hid_size = 32
    n_tokens = 50
    n_cat_features = 4
    # concat_number_of_features = 3 * hid_size (title_pool + full_pool + category)

    key = jax.random.PRNGKey(0)
    k_params, k_i1, k_i2, k_i3 = jax.random.split(key, 4)

    params = init_params(k_params, n_tokens, n_cat_features, hid_size)
    input1 = jax.random.randint(k_i1, (B, T1), 0, n_tokens, dtype=jnp.int32)
    input2 = jax.random.randint(k_i2, (B, T2), 0, n_tokens, dtype=jnp.int32)
    input3 = jax.random.normal(k_i3, (B, n_cat_features), jnp.float32)

    out = three_inputs_net(params, input1, input2, input3)
    jax.block_until_ready(out)
    assert out.shape == (B, 1) and out.dtype == jnp.float32

    ref = reference_forward(params, input1, input2, input3, hid_size, n_tokens)
    assert jnp.allclose(out, ref, rtol=1e-2, atol=1e-2), (out, ref)
    print("KERNEL_OK")
</pallas_src>

<mosaic_0001>
module attributes {stable_mosaic.version = 11 : i64} {
  func.func @three_inputs_kernel(%arg0: memref<16x1xi32, #tpu.memory_space<vmem>>, %arg1: memref<20x1xi32, #tpu.memory_space<vmem>>, %arg2: memref<2x4xf32, #tpu.memory_space<vmem>>, %arg3: memref<100x32xf32, #tpu.memory_space<vmem>>, %arg4: memref<128x32xf32, #tpu.memory_space<vmem>>, %arg5: memref<4x32xf32, #tpu.memory_space<vmem>>, %arg6: memref<96x64xf32, #tpu.memory_space<vmem>>, %arg7: memref<64x1xf32, #tpu.memory_space<vmem>>, %arg8: memref<5x64xf32, #tpu.memory_space<vmem>>, %arg9: memref<2x1xf32, #tpu.memory_space<vmem>>) attributes {dimension_semantics = [], scalar_prefetch = 0 : i64, scratch_operands = 0 : i64, tpu.core_type = #tpu.core_type<tc>} {
    %c0 = arith.constant 0 : index
    %c0_0 = arith.constant 0 : index
    %0 = vector.load %arg4[%c0, %c0_0] : memref<128x32xf32, #tpu.memory_space<vmem>>, vector<64x32xf32>
    %c0_1 = arith.constant 0 : index
    %c0_2 = arith.constant 0 : index
    %1 = vector.load %arg8[%c0_1, %c0_2] : memref<5x64xf32, #tpu.memory_space<vmem>>, vector<1x32xf32>
    %c0_3 = arith.constant 0 : index
    %c0_4 = arith.constant 0 : index
    %2 = vector.load %arg0[%c0_3, %c0_4] : memref<16x1xi32, #tpu.memory_space<vmem>>, vector<16x1xi32>
    %3 = tpu.iota {dimensions = array<i32: 1>} : vector<16x100xi32>
    %c0_i32 = arith.constant 0 : i32
    %4 = vector.broadcast %c0_i32 : i32 to vector<16x1xi32>
    %5 = arith.addi %2, %4 : vector<16x1xi32>
    %6 = vector.broadcast %5 : vector<16x1xi32> to vector<16x100xi32>
    %7 = arith.cmpi eq, %3, %6 : vector<16x100xi32>
    %8 = arith.extui %7 : vector<16x100xi1> to vector<16x100xi32>
    %9 = arith.sitofp %8 : vector<16x100xi32> to vector<16x100xf32>
    %c0_5 = arith.constant 0 : index
    %c0_6 = arith.constant 0 : index
    %10 = vector.load %arg3[%c0_5, %c0_6] : memref<100x32xf32, #tpu.memory_space<vmem>>, vector<100x32xf32>
    %cst = arith.constant dense<0.000000e+00> : vector<16x32xf32>
    %11 = tpu.matmul %9, %10, %cst {dimension_numbers = #tpu.dot_dimension_numbers<[1], [0], [0], [1], [0, 0, 1, 1], [], []>} : vector<16x100xf32>, vector<100x32xf32>, vector<16x32xf32> -> vector<16x32xf32>
    %12 = vector.extract_strided_slice %11 {offsets = [1, 0], sizes = [15, 32], strides = [1, 1]} : vector<16x32xf32> to vector<15x32xf32>
    %13 = vector.extract_strided_slice %11 {offsets = [0, 0], sizes = [1, 32], strides = [1, 1]} : vector<16x32xf32> to vector<1x32xf32>
    %14 = tpu.concatenate %12, %13 in 0 : vector<15x32xf32>, vector<1x32xf32> -> vector<16x32xf32>
    %15 = tpu.concatenate %11, %14 in 1 : vector<16x32xf32>, vector<16x32xf32> -> vector<16x64xf32>
    %cst_7 = arith.constant dense<0.000000e+00> : vector<16x32xf32>
    %16 = tpu.matmul %15, %0, %cst_7 {dimension_numbers = #tpu.dot_dimension_numbers<[1], [0], [0], [1], [0, 0, 1, 1], [], []>} : vector<16x64xf32>, vector<64x32xf32>, vector<16x32xf32> -> vector<16x32xf32>
    %17 = vector.broadcast %1 : vector<1x32xf32> to vector<16x32xf32>
    %18 = arith.addf %16, %17 : vector<16x32xf32>
    %cst_8 = arith.constant 0.000000e+00 : f32
    %19 = vector.broadcast %cst_8 : f32 to vector<16x32xf32>
    %20 = arith.maximumf %18, %19 : vector<16x32xf32>
    %21 = tpu.iota {dimensions = array<i32: 1>} : vector<2x16xi32>
    %22 = tpu.iota {dimensions = array<i32: 0>} : vector<2x16xi32>
    %c8_i32 = arith.constant 8 : i32
    %23 = vector.broadcast %c8_i32 : i32 to vector<2x16xi32>
    %24 = arith.muli %22, %23 : vector<2x16xi32>
    %25 = arith.cmpi sge, %21, %24 : vector<2x16xi32>
    %c7_i32 = arith.constant 7 : i32
    %26 = vector.broadcast %c7_i32 : i32 to vector<2x16xi32>
    %27 = arith.addi %24, %26 : vector<2x16xi32>
    %28 = arith.cmpi slt, %21, %27 : vector<2x16xi32>
    %29 = arith.andi %25, %28 : vector<2x16xi1>
    %cst_9 = arith.constant 0.142857149 : f32
    %cst_10 = arith.constant 0.000000e+00 : f32
    %30 = vector.broadcast %cst_9 : f32 to vector<2x16xf32>
    %31 = vector.broadcast %cst_10 : f32 to vector<2x16xf32>
    %32 = arith.select %29, %30, %31 : vector<2x16xi1>, vector<2x16xf32>
    %cst_11 = arith.constant dense<0.000000e+00> : vector<2x32xf32>
    %33 = tpu.matmul %32, %20, %cst_11 {dimension_numbers = #tpu.dot_dimension_numbers<[1], [0], [0], [1], [0, 0, 1, 1], [], []>} : vector<2x16xf32>, vector<16x32xf32>, vector<2x32xf32> -> vector<2x32xf32>
    %c64 = arith.constant 64 : index
    %c0_12 = arith.constant 0 : index
    %34 = vector.load %arg4[%c64, %c0_12] : memref<128x32xf32, #tpu.memory_space<vmem>>, vector<64x32xf32>
    %c1 = arith.constant 1 : index
    %c0_13 = arith.constant 0 : index
    %35 = vector.load %arg8[%c1, %c0_13] : memref<5x64xf32, #tpu.memory_space<vmem>>, vector<1x32xf32>
    %c0_14 = arith.constant 0 : index
    %c0_15 = arith.constant 0 : index
    %36 = vector.load %arg1[%c0_14, %c0_15] : memref<20x1xi32, #tpu.memory_space<vmem>>, vector<20x1xi32>
    %37 = tpu.iota {dimensions = array<i32: 1>} : vector<20x100xi32>
    %c50_i32 = arith.constant 50 : i32
    %38 = vector.broadcast %c50_i32 : i32 to vector<20x1xi32>
    %39 = arith.addi %36, %38 : vector<20x1xi32>
    %40 = vector.broadcast %39 : vector<20x1xi32> to vector<20x100xi32>
    %41 = arith.cmpi eq, %37, %40 : vector<20x100xi32>
    %42 = arith.extui %41 : vector<20x100xi1> to vector<20x100xi32>
    %43 = arith.sitofp %42 : vector<20x100xi32> to vector<20x100xf32>
    %c0_16 = arith.constant 0 : index
    %c0_17 = arith.constant 0 : index
    %44 = vector.load %arg3[%c0_16, %c0_17] : memref<100x32xf32, #tpu.memory_space<vmem>>, vector<100x32xf32>
    %cst_18 = arith.constant dense<0.000000e+00> : vector<20x32xf32>
    %45 = tpu.matmul %43, %44, %cst_18 {dimension_numbers = #tpu.dot_dimension_numbers<[1], [0], [0], [1], [0, 0, 1, 1], [], []>} : vector<20x100xf32>, vector<100x32xf32>, vector<20x32xf32> -> vector<20x32xf32>
    %46 = vector.extract_strided_slice %45 {offsets = [1, 0], sizes = [19, 32], strides = [1, 1]} : vector<20x32xf32> to vector<19x32xf32>
    %47 = vector.extract_strided_slice %45 {offsets = [0, 0], sizes = [1, 32], strides = [1, 1]} : vector<20x32xf32> to vector<1x32xf32>
    %48 = tpu.concatenate %46, %47 in 0 : vector<19x32xf32>, vector<1x32xf32> -> vector<20x32xf32>
    %49 = tpu.concatenate %45, %48 in 1 : vector<20x32xf32>, vector<20x32xf32> -> vector<20x64xf32>
    %cst_19 = arith.constant dense<0.000000e+00> : vector<20x32xf32>
    %50 = tpu.matmul %49, %34, %cst_19 {dimension_numbers = #tpu.dot_dimension_numbers<[1], [0], [0], [1], [0, 0, 1, 1], [], []>} : vector<20x64xf32>, vector<64x32xf32>, vector<20x32xf32> -> vector<20x32xf32>
    %51 = vector.broadcast %35 : vector<1x32xf32> to vector<20x32xf32>
    %52 = arith.addf %50, %51 : vector<20x32xf32>
    %cst_20 = arith.constant 0.000000e+00 : f32
    %53 = vector.broadcast %cst_20 : f32 to vector<20x32xf32>
    %54 = arith.maximumf %52, %53 : vector<20x32xf32>
    %55 = tpu.iota {dimensions = array<i32: 1>} : vector<2x20xi32>
    %56 = tpu.iota {dimensions = array<i32: 0>} : vector<2x20xi32>
    %c10_i32 = arith.constant 10 : i32
    %57 = vector.broadcast %c10_i32 : i32 to vector<2x20xi32>
    %58 = arith.muli %56, %57 : vector<2x20xi32>
    %59 = arith.cmpi sge, %55, %58 : vector<2x20xi32>
    %c9_i32 = arith.constant 9 : i32
    %60 = vector.broadcast %c9_i32 : i32 to vector<2x20xi32>
    %61 = arith.addi %58, %60 : vector<2x20xi32>
    %62 = arith.cmpi slt, %55, %61 : vector<2x20xi32>
    %63 = arith.andi %59, %62 : vector<2x20xi1>
    %cst_21 = arith.constant 0.111111112 : f32
    %cst_22 = arith.constant 0.000000e+00 : f32
    %64 = vector.broadcast %cst_21 : f32 to vector<2x20xf32>
    %65 = vector.broadcast %cst_22 : f32 to vector<2x20xf32>
    %66 = arith.select %63, %64, %65 : vector<2x20xi1>, vector<2x20xf32>
    %cst_23 = arith.constant dense<0.000000e+00> : vector<2x32xf32>
    %67 = tpu.matmul %66, %54, %cst_23 {dimension_numbers = #tpu.dot_dimension_numbers<[1], [0], [0], [1], [0, 0, 1, 1], [], []>} : vector<2x20xf32>, vector<20x32xf32>, vector<2x32xf32> -> vector<2x32xf32>
    %c0_24 = arith.constant 0 : index
    %c0_25 = arith.constant 0 : index
    %68 = vector.load %arg2[%c0_24, %c0_25] : memref<2x4xf32, #tpu.memory_space<vmem>>, vector<2x4xf32>
    %c0_26 = arith.constant 0 : index
    %c0_27 = arith.constant 0 : index
    %69 = vector.load %arg5[%c0_26, %c0_27] : memref<4x32xf32, #tpu.memory_space<vmem>>, vector<4x32xf32>
    %cst_28 = arith.constant dense<0.000000e+00> : vector<2x32xf32>
    %70 = tpu.matmul %68, %69, %cst_28 {dimension_numbers = #tpu.dot_dimension_numbers<[1], [0], [0], [1], [0, 0, 1, 1], [], []>} : vector<2x4xf32>, vector<4x32xf32>, vector<2x32xf32> -> vector<2x32xf32>
    %c2 = arith.constant 2 : index
    %c0_29 = arith.constant 0 : index
    %71 = vector.load %arg8[%c2, %c0_29] : memref<5x64xf32, #tpu.memory_space<vmem>>, vector<1x32xf32>
    %72 = vector.broadcast %71 : vector<1x32xf32> to vector<2x32xf32>
    %73 = arith.addf %70, %72 : vector<2x32xf32>
    %74 = tpu.concatenate %33, %67, %73 in 1 : vector<2x32xf32>, vector<2x32xf32>, vector<2x32xf32> -> vector<2x96xf32>
    %c0_30 = arith.constant 0 : index
    %c0_31 = arith.constant 0 : index
    %75 = vector.load %arg6[%c0_30, %c0_31] : memref<96x64xf32, #tpu.memory_space<vmem>>, vector<96x64xf32>
    %cst_32 = arith.constant dense<0.000000e+00> : vector<2x64xf32>
    %76 = tpu.matmul %74, %75, %cst_32 {dimension_numbers = #tpu.dot_dimension_numbers<[1], [0], [0], [1], [0, 0, 1, 1], [], []>} : vector<2x96xf32>, vector<96x64xf32>, vector<2x64xf32> -> vector<2x64xf32>
    %c3 = arith.constant 3 : index
    %c0_33 = arith.constant 0 : index
    %77 = vector.load %arg8[%c3, %c0_33] : memref<5x64xf32, #tpu.memory_space<vmem>>, vector<1x64xf32>
    %78 = vector.broadcast %77 : vector<1x64xf32> to vector<2x64xf32>
    %79 = arith.addf %76, %78 : vector<2x64xf32>
    %c0_34 = arith.constant 0 : index
    %c0_35 = arith.constant 0 : index
    %80 = vector.load %arg7[%c0_34, %c0_35] : memref<64x1xf32, #tpu.memory_space<vmem>>, vector<64x1xf32>
    %cst_36 = arith.constant dense<0.000000e+00> : vector<2x1xf32>
    %81 = tpu.matmul %79, %80, %cst_36 {dimension_numbers = #tpu.dot_dimension_numbers<[1], [0], [0], [1], [0, 0, 1, 1], [], []>} : vector<2x64xf32>, vector<64x1xf32>, vector<2x1xf32> -> vector<2x1xf32>
    %c4 = arith.constant 4 : index
    %c0_37 = arith.constant 0 : index
    %82 = vector.load %arg8[%c4, %c0_37] : memref<5x64xf32, #tpu.memory_space<vmem>>, vector<1x1xf32>
    %83 = vector.broadcast %82 : vector<1x1xf32> to vector<2x1xf32>
    %84 = arith.addf %81, %83 : vector<2x1xf32>
    %c0_38 = arith.constant 0 : index
    %c0_39 = arith.constant 0 : index
    %85 = vector.load %arg9[%c0_38, %c0_39] : memref<2x1xf32, #tpu.memory_space<vmem>>, vector<2x1xf32>
    tpu.vector_store %arg9[%c0_38, %c0_39], %84 {strides = array<i32>} : memref<2x1xf32, #tpu.memory_space<vmem>>, vector<2x1xf32>,
    return
  }
}

</mosaic_0001>

<bundles_post_ra>
// kernel: tpu_custom_call.1
= control target key start
LH: loop header
LB: loop body
LE: loop exit
PB: predicated region body
PF: predicated region fallthrough
CT: control target
= control target key end

     0   :  { %v1350_v0 = vmov 0   ;;  %vm77_vm0 = vcmask 1043456   ;;  %v43_v26 = vlaneseq  ;;  %vm70_vm1 = vcmask 818176   ;;  %s1352_s14 = smov 32   ;;  %s1355_s23 = smov 64   ;;  %s1732_s0 = inlined_call_operand.vmem [shape: s32[16,1], index: 0, kind: input, shape index: {}]   ;;  %s1733_s1 = inlined_call_operand.vmem [shape: s32[20,1], index: 1, kind: input, shape index: {}]   ;;  %s1734_s3 = inlined_call_operand.vmem [shape: f32[100,32], index: 3, kind: input, shape index: {}]   ;;  %s1735_s4 = inlined_call_operand.vmem [shape: f32[128,32], index: 4, kind: input, shape index: {}]   ;;  %s1736_s8 = inlined_call_operand.vmem [shape: f32[5,64], index: 8, kind: input, shape index: {}]   ;;  %s1737_s5 = inlined_call_operand.vmem [shape: f32[4,32], index: 5, kind: input, shape index: {}]   ;;  %s1738_s2 = inlined_call_operand.vmem [shape: f32[2,4], index: 2, kind: input, shape index: {}]   ;;  %s1739_s6 = inlined_call_operand.vmem [shape: f32[96,64], index: 6, kind: input, shape index: {}]   ;;  %s1740_s7 = inlined_call_operand.vmem [shape: f32[64,1], index: 7, kind: input, shape index: {}]   ;;  %s1741_s9 = inlined_call_operand.vmem [shape: f32[2,1], index: 9, kind: output, shape index: {}]  }
   0x1   :  { %1348 = vset.pattern.permute.xlu0 %v1350_v0  ;;  %v41_v1 = vld [vmem:[%s1732_s0] sm:$0xff]  ;;  %1349 = vset.pattern.permute.xlu1 %v1350_v0  ;;  %v42_v2 = vld [vmem:[%s1732_s0 + $0x8] sm:$0xff]  ;;  %v59_v7 = vld [vmem:[%s1734_s3 + $0x10] sm:$0xff]  ;;  %v1351_v29 = vmov 0.0   ;;  %vm158_vm4 = vcmask 1046528   ;;  %vm172_vm5 = vcmask 261120  }
   0x2   :  { %46 = vperm.xlu0 %1348, %v41_v1   ;;  %v57_v3 = vld [vmem:[%s1734_s3] sm:$0xff]  ;;  %v58_v4 = vld [vmem:[%s1734_s3 + $0x8] sm:$0xff]  ;;  %v60_v8 = vld [vmem:[%s1734_s3 + $0x18] sm:$0xff]  ;;  %v1487_v27 = vand.u32 127, %v43_v26  ;;  %vm179_vm6 = vcmask 523264   ;;  %v1353_v57 = vmov 0.0|0.0  }
   0x3   :  { %v354_v5 = vld [vmem:[%s1733_s1] sm:$0xff]  ;;  %v1421_v6 = vpack.c.bf16 %v58_v4, %v57_v3  ;;  %v1429_v9 = vpack.c.bf16 %v60_v8, %v59_v7  ;;  %v62_v11 = vld [vmem:[%s1734_s3 + $0x28] sm:$0xff]  ;;  %v356_v13 = vld [vmem:[%s1733_s1 + $0x10] sm:$0xf]  ;;  %vm1354_vm7 = vmmov 0   ;;  %v1536_v58 = vshrl.u32 %v43_v26, 7 }
   0x4   :  { %v61_v10 = vld [vmem:[%s1734_s3 + $0x20] sm:$0xff]  ;;  %v357_v12 = vadd.s32 50, %v354_v5  ;;  %v63_v15 = vld [vmem:[%s1734_s3 + $0x30] sm:$0xff]  ;;  %v64_v16 = vld [vmem:[%s1734_s3 + $0x38] sm:$0xff]  ;;  %v359_v17 = vadd.s32 50, %v356_v13  ;;  %vm271_vm11 = vcmask 130048  }
   0x5   :  { %1237 = vmatprep.subr.bf16.mxu0 %v1421_v6  ;;  %v1443_v14 = vpack.c.bf16 %v62_v11, %v61_v10  ;;  %v1453_v18 = vpack.c.bf16 %v64_v16, %v63_v15  ;;  %v65_v19 = vld [vmem:[%s1734_s3 + $0x40] sm:$0xff]  ;;  %v66_v20 = vld [vmem:[%s1734_s3 + $0x48] sm:$0xff]  ;;  %v67_v22 = vld [vmem:[%s1734_s3 + $0x50] sm:$0xff]  ;;  %v265_v59 = vmul.u32 8, %v1536_v58  ;;  %vm478_vm15 = vcmask 1042432  }
   0x6   :  { %49 = vperm.xlu0 %1348, %v42_v2   ;;  %1239 = vmatpush3.bf16.msra.mxu0 %v1421_v6  ;;  %v1463_v21 = vpack.c.bf16 %v66_v20, %v65_v19  ;;  %v68_v23 = vld [vmem:[%s1734_s3 + $0x58] sm:$0xff]  ;;  %v1480_v25 = vld [vmem:[%s1734_s3 + $0x60] sm:$0xf]  ;;  %v33_v34 = vld [vmem:[%s1735_s4 + $0x8] sm:$0xff] }
   0x7   :  { %1241 = vmatprep.subr.bf16.mxu0 %v1429_v9  ;;  %v1473_v24 = vpack.c.bf16 %v68_v23, %v67_v22  ;;  %v32_v33 = vld [vmem:[%s1735_s4] sm:$0xff]  ;;  %v34_v35 = vld [vmem:[%s1735_s4 + $0x10] sm:$0xff]  ;;  %v35_v37 = vld [vmem:[%s1735_s4 + $0x18] sm:$0xff]  ;;  %v267_v61 = vadd.s32 7, %v265_v59  ;;  %vm266_vm8 = vcmp.ge.s32.totalorder %v1487_v27, %v265_v59 }
   0x8   :  { %v1260_v36 = vpack.c.bf16 %v33_v34, %v32_v33  ;;  %v1264_v38 = vpack.c.bf16 %v35_v37, %v34_v35  ;;  %v36_v39 = vld [vmem:[%s1735_s4 + $0x20] sm:$0xff]  ;;  %v37_v40 = vld [vmem:[%s1735_s4 + $0x28] sm:$0xff]  ;;  %v38_v42 = vld [vmem:[%s1735_s4 + $0x30] sm:$0xff] }
   0x9   :  { %v1268_v41 = vpack.c.bf16 %v37_v40, %v36_v39  ;;  %v39_v43 = vld [vmem:[%s1735_s4 + $0x38] sm:$0xff]  ;;  %v355_v51 = vld [vmem:[%s1733_s1 + $0x8] sm:$0xff]  ;;  %v954_v60 = vld [vmem:[%s1736_s8] ss:$0 sm:$0xff]  ;;  %vm268_vm9 = vcmp.lt.s32.totalorder %v1487_v27, %v267_v61 }
   0xa   :  { %361 = vperm.xlu0 %1348, %v357_v12   ;;  %1243 = vmatpush3.bf16.msra.mxu0 %v1429_v9  ;;  %v1272_v44 = vpack.c.bf16 %v39_v43, %v38_v42  ;;  %v358_v52 = vadd.s32 50, %v355_v51  ;;  %vm269_vm10 = vmand %vm266_vm8, %vm268_vm9  ;;  %v345_v12 = vld [vmem:[%s1735_s4 + $0x40] sm:$0xff]  ;;  %v346_v13 = vld [vmem:[%s1735_s4 + $0x48] sm:$0xff]  ;;  %vm679_vm8 = vcmask 31744  }
   0xb   :  { %1245 = vmatprep.subr.bf16.mxu0 %v1443_v14  ;;  %1261 = vmatprep.subr.bf16.mxu1 %v1260_v36  ;;  %v270_v5 = vsel %vm269_vm10, 0.14285715, %v1351_v29  ;;  %v1298_v15 = vpack.c.bf16 %v346_v13, %v345_v12  ;;  %v348_v16 = vld [vmem:[%s1735_s4 + $0x58] sm:$0xff]  ;;  %v350_v19 = vld [vmem:[%s1735_s4 + $0x68] sm:$0xff]  ;;  %v774_v13 = vld [vmem:[%s1739_s6 + $0x40] sm:$0xff] }
   0xc   :  { %1263 = vmatpush3.bf16.msra.mxu1 %v1260_v36  ;;  %v352_v22 = vld [vmem:[%s1735_s4 + $0x78] sm:$0xff] }
   0xd   :  { %1265 = vmatprep.subr.bf16.mxu1 %v1264_v38 }
   0xe   :  { %367 = vperm.xlu0 %1348, %v359_v17   ;;  %1247 = vmatpush3.bf16.msra.mxu0 %v1443_v14 }
   0xf   :  { %1249 = vmatprep.subr.bf16.mxu0 %v1453_v18 }
  0x10   :  { %1267 = vmatpush3.bf16.msra.mxu1 %v1264_v38 }
  0x11   :  { %1269 = vmatprep.subr.bf16.mxu1 %v1268_v41 }
  0x12   :  { %1251 = vmatpush3.bf16.msra.mxu0 %v1453_v18 }
  0x13   :  { %1253 = vmatprep.subr.bf16.mxu0 %v1463_v21 }
  0x14   :  { %1271 = vmatpush3.bf16.msra.mxu1 %v1268_v41 }
  0x15   :  { %1273 = vmatprep.subr.bf16.mxu1 %v1272_v44 }
  0x16   :  { %1255 = vmatpush3.bf16.msra.mxu0 %v1463_v21 }
  0x17   :  { %1257 = vmatprep.subr.bf16.mxu0 %v1473_v24 }
  0x18   :  { %1275 = vmatpush3.bf16.msra.mxu1 %v1272_v44 }
  0x19   :  { %1276 = vmatprep.subr.bf16.mxu1 %v1353_v57 }
  0x1a   :  { %1259 = vmatpush3.bf16.msra.mxu0 %v1473_v24 }
  0x1b   :  { %1085 = vmatprep.subr.msk.mxu0 %vm77_vm0, %v1480_v25 }
  0x1e   :  { %1086 = vmatpush3.msk.msra.mxu0 %vm77_vm0, %v1480_v25 }
  0x1f   :  { %1297 = vmatprep.subr.bf16.mxu0 %v1353_v57 }
  0x81   :  { %v47_v28 = vpop.permute.xlu0 %46 }
  0x82   :  { %vm51_vm2 = vcmp.eq.s32.totalorder %v1487_v27, %v47_v28 }
  0x83   :  { %v949_v30 = vsel %vm51_vm2, 1.0, %v1351_v29 }
  0x84   :  { %1087 = vmatprep.mubr.msk.f32.mxu0 %vm70_vm1, %v949_v30 }
  0x85   :  { %v50_v31 = vpop.permute.xlu0 %49 }
  0x86   :  { %vm52_vm3 = vcmp.eq.s32.totalorder %v1487_v27, %v50_v31 }
  0x87   :  { %v950_v32 = vsel %vm52_vm3, 1.0, %v1351_v29 }
  0x88   :  { %1088 = vmatmul.mubr.msk.f32.vlgmr.msra.gmra.mrb[0].mxu0 %vm70_vm1, %v950_v32 }
  0x89   :  { %1167 = vmatprep.mubr.msk.f32.mxu0 %vm1354_vm7, %v1351_v29  ;;  %1299 = vmatpush3.bf16.msra.mxu0 %v1298_v15 }
  0x8a   :  { %1300 = vmatprep.subr.bf16.mxu0 %v1353_v57 }
 0x15b   :  { %v1089_v45 = vpop.f32.mrb[0].mxu0 }
 0x15c   :  { %v160_v46 = vrot.slane %v1089_v45, 1  ;;  %v147_v47 = vpop.f32.mrb[1].mxu0 }
 0x15d   :  { %v159_v48 = vrot.slane %v147_v47, 1 }
 0x15f   :  { %v161_v49 = vsel %vm158_vm4, %v159_v48, %v160_v46  ;;  %v164_v50 = vsel %vm158_vm4, %v160_v46, %v159_v48  ;;  %v965_v48 = vld [vmem:[%s1736_s8 + $0x1] ss:$0 sm:$0xff] }
 0x160   :  { %166 = vrot.lane.b32.xlu1 %v161_v49, %s1352_s14 }
 0x164   :  { %168 = vrot.lane.b32.xlu1 %v164_v50, %s1352_s14 }
 0x168   :  { %364 = vperm.xlu1 %1349, %v358_v52  }
 0x1d2   :  { %v167_v53 = vpop.permute.xlu1 %166 }
 0x1d3   :  { %v173_v54 = vsel %vm172_vm5, %v147_v47, %v167_v53  ;;  %v589_v47 = vmul.u32 10, %v1536_v58 }
 0x1d4   :  { %1106 = vmatprep.mubr.msk.f32.mxu1 %vm179_vm6, %v173_v54 }
 0x1d5   :  { %v591_v52 = vadd.s32 9, %v589_v47 }
 0x1d6   :  { %v169_v55 = vpop.permute.xlu1 %168 }
 0x1d7   :  { %v174_v56 = vsel %vm172_vm5, %v1089_v45, %v169_v55  ;;  %vm592_vm2 = vcmp.lt.s32.totalorder %v1487_v27, %v591_v52 }
 0x1d8   :  { %1107 = vmatmul.mubr.msk.f32.vlgmr.msra.gmra.mrb[0].mxu1 %vm179_vm6, %v174_v56 }
 0x1d9   :  { %1113 = vmatprep.mubr.msk.f32.mxu1 %vm1354_vm7, %v1351_v29 }
 0x1e7   :  { %v365_v7 = vpop.permute.xlu1 %364 }
 0x1e8   :  { %vm370_vm13 = vcmp.eq.s32.totalorder %v1487_v27, %v365_v7 }
 0x1e9   :  { %v959_v10 = vsel %vm370_vm13, 1.0, %v1351_v29 }
 0x2ab   :  { %v1108_v62 = vpop.f32.mrb[0].mxu1 }
 0x2ac   :  { %v258_v63 = vadd.f32 %v1108_v62, %v954_v60  ;;  %v252_v0 = vpop.f32.mrb[1].mxu1 }
 0x2ad   :  { %v253_v1 = vadd.f32 %v954_v60, %v252_v0 }
 0x2ae   :  { %v262_v2 = vmax.f32 %v258_v63, 0.0 }
 0x2af   :  { %v261_v3 = vmax.f32 %v253_v1, 0.0  ;;  %v673_v1 = vld [vmem:[%s1737_s5] sm:$0xf] }
 0x2b1   :  { %v1277_v4 = vpack.c.bf16 %v262_v2, %v261_v3  ;;  %v766_v2 = vld [vmem:[%s1739_s6] sm:$0xff]  ;;  %v767_v3 = vld [vmem:[%s1739_s6 + $0x8] sm:$0xff] }
 0x2b3   :  { %1278 = vmatpush3.bf16.msra.mxu1 %v1277_v4  ;;  %v768_v4 = vld [vmem:[%s1739_s6 + $0x10] sm:$0xff] }
 0x2b4   :  { %1279 = vmatprep.subr.bf16.mxu1 %v1353_v57 }
 0x2b6   :  { %1114 = vmatmul.mubr.msk.f32.vlgmr.msra.gmra.mrb[2].mxu1 %vm271_vm11, %v270_v5  ;;  %v1313_v5 = vpack.c.bf16 %v767_v3, %v766_v2 }
 0x2b7   :  { %1281 = vmatpush3.bf16.msra.mxu1 %v1421_v6  ;;  %1142 = vmatprep.mubr.msk.f32.mxu1 %vm1354_vm7, %v1351_v29  ;;  %v362_v6 = vpop.permute.xlu0 %361 }
 0x2b8   :  { %1282 = vmatprep.subr.bf16.mxu1 %v1353_v57  ;;  %vm369_vm12 = vcmp.eq.s32.totalorder %v1487_v27, %v362_v6  ;;  %v769_v6 = vld [vmem:[%s1739_s6 + $0x18] sm:$0xff] }
 0x2b9   :  { %v958_v8 = vsel %vm369_vm12, 1.0, %v1351_v29  ;;  %v1316_v7 = vpack.c.bf16 %v769_v6, %v768_v4 }
 0x2bb   :  { %1284 = vmatpush3.bf16.msra.mxu1 %v1429_v9  ;;  %v368_v9 = vpop.permute.xlu0 %367 }
 0x2bc   :  { %1285 = vmatprep.subr.bf16.mxu1 %v1353_v57  ;;  %vm371_vm14 = vcmp.eq.s32.totalorder %v1487_v27, %v368_v9 }
 0x2bd   :  { %v960_v11 = vsel %vm371_vm14, 1.0, %v1351_v29 }
 0x2bf   :  { %1287 = vmatpush3.bf16.msra.mxu1 %v1443_v14  ;;  %v347_v14 = vld [vmem:[%s1735_s4 + $0x50] sm:$0xff] }
 0x2c0   :  { %1288 = vmatprep.subr.bf16.mxu1 %v1353_v57  ;;  %v1301_v17 = vpack.c.bf16 %v348_v16, %v347_v14  ;;  %v775_v14 = vld [vmem:[%s1739_s6 + $0x48] sm:$0xff]  ;;  %v776_v16 = vld [vmem:[%s1739_s6 + $0x50] sm:$0xff] }
 0x2c1   :  { %v1325_v15 = vpack.c.bf16 %v775_v14, %v774_v13 }
 0x2c2   :  { %1302 = vmatpush3.bf16.msra.mxu0 %v1301_v17  ;;  %v777_v17 = vld [vmem:[%s1739_s6 + $0x58] sm:$0xff] }
 0x2c3   :  { %1290 = vmatpush3.bf16.msra.mxu1 %v1453_v18  ;;  %v349_v18 = vld [vmem:[%s1735_s4 + $0x60] sm:$0xff]  ;;  %1303 = vmatprep.subr.bf16.mxu0 %v1353_v57 }
 0x2c4   :  { %1291 = vmatprep.subr.bf16.mxu1 %v1353_v57  ;;  %v1304_v20 = vpack.c.bf16 %v350_v19, %v349_v18  ;;  %v1328_v18 = vpack.c.bf16 %v777_v17, %v776_v16  ;;  %v857_v19 = vld [vmem:[%s1740_s7] sm:$0xff] }
 0x2c6   :  { %1305 = vmatpush3.bf16.msra.mxu0 %v1304_v20  ;;  %v858_v20 = vld [vmem:[%s1740_s7 + $0x8] sm:$0xff] }
 0x2c7   :  { %1293 = vmatpush3.bf16.msra.mxu1 %v1463_v21  ;;  %v351_v21 = vld [vmem:[%s1735_s4 + $0x70] sm:$0xff]  ;;  %1306 = vmatprep.subr.bf16.mxu0 %v1353_v57 }
 0x2c8   :  { %1294 = vmatprep.subr.bf16.mxu1 %v1353_v57  ;;  %v1307_v23 = vpack.c.bf16 %v352_v22, %v351_v21  ;;  %v859_v21 = vld [vmem:[%s1740_s7 + $0x10] sm:$0xff]  ;;  %v1331_v22 = vpack.c.bf16 %v858_v20, %v857_v19 }
 0x2ca   :  { %1308 = vmatpush3.bf16.msra.mxu0 %v1307_v23  ;;  %v860_v23 = vld [vmem:[%s1740_s7 + $0x18] sm:$0xff] }
 0x2cb   :  { %1296 = vmatpush3.bf16.msra.mxu1 %v1473_v24  ;;  %1309 = vmatprep.subr.bf16.mxu0 %v1353_v57 }
 0x2cc   :  { %1140 = vmatprep.subr.mxu1 %v1351_v29 }
 0x2cf   :  { %1141 = vmatpush3.msk.msra.mxu1 %vm77_vm0, %v1480_v25 }
 0x2d0   :  { %1143 = vmatmul.mubr.msk.f32.vlgmr.msra.gmra.mrb[4].mxu1 %vm70_vm1, %v958_v8  ;;  %1312 = vmatprep.subr.bf16.mxu1 %v1353_v57  ;;  %v771_v8 = vld [vmem:[%s1739_s6 + $0x28] sm:$0xff] }
 0x2d1   :  { %1145 = vmatprep.mubr.msk.f32.mxu1 %vm1354_vm7, %v1351_v29  ;;  %1314 = vmatpush3.bf16.msra.mxu1 %v1313_v5 }
 0x2d2   :  { %1315 = vmatprep.subr.bf16.mxu1 %v1353_v57 }
 0x2d4   :  { %1146 = vmatmul.mubr.msk.f32.gmra.mrb[6].mxu1 %vm70_vm1, %v959_v10  ;;  %v772_v10 = vld [vmem:[%s1739_s6 + $0x30] sm:$0xff] }
 0x2d5   :  { %1148 = vmatprep.mubr.msk.f32.mxu1 %vm1354_vm7, %v1351_v29  ;;  %1317 = vmatpush3.bf16.msra.mxu1 %v1316_v7 }
 0x2d6   :  { %1318 = vmatprep.subr.bf16.mxu1 %v1353_v57 }
 0x2d8   :  { %1149 = vmatmul.mubr.msk.f32.gmra.mrb[8].mxu1 %vm70_vm1, %v960_v11  ;;  %vm590_vm1 = vcmp.ge.s32.totalorder %v1487_v27, %v589_v47  ;;  %v672_v27 = vld [vmem:[%s1738_s2] sm:$0x3]  ;;  %v773_v11 = vld [vmem:[%s1739_s6 + $0x38] sm:$0xff] }
 0x2d9   :  { %1214 = vmatprep.mubr.msk.f32.mxu1 %vm1354_vm7, %v1351_v29  ;;  %vm593_vm3 = vmand %vm590_vm1, %vm592_vm2  ;;  %v1322_v12 = vpack.c.bf16 %v773_v11, %v772_v10 }
 0x2da   :  { %v594_v0 = vsel %vm593_vm3, 0.11111111, %v1351_v29 }
 0x389   :  { %v1606_v24 = vpop.f32.mrb[2].mxu1 }
 0x38a   :  { %v1115_v25 = vpop.f32.mrb[3].mxu1 }
 0x38b   :  { %v1334_v25 = vpack.c.bf16 %v860_v23, %v859_v21 }
 0x3a3   :  { %v453_v26 = vpop.f32.mrb[4].mxu1 }
 0x3a4   :  { %v1144_v28 = vpop.f32.mrb[5].mxu1  ;;  %v470_v31 = vrot.slane %v453_v26, 1  ;;  %v476_v36 = vrot.slane %v453_v26, 5 }
 0x3a5   :  { %v861_v28 = vld [vmem:[%s1740_s7 + $0x20] sm:$0xff] }
 0x3a7   :  { %v458_v30 = vpop.f32.mrb[6].mxu1 }
 0x3a8   :  { %v471_v32 = vrot.slane %v458_v30, 1  ;;  %v1147_v33 = vpop.f32.mrb[7].mxu1 }
 0x3aa   :  { %v472_v34 = vsel %vm158_vm4, %v470_v31, %v471_v32 }
 0x3ab   :  { %481 = vrot.lane.b32.xlu1 %v472_v34, %s1352_s14  ;;  %v463_v35 = vpop.f32.mrb[8].mxu1 }
 0x3ac   :  { %v473_v37 = vrot.slane %v463_v35, 1  ;;  %v1150_v38 = vpop.f32.mrb[9].mxu1 }
 0x3ae   :  { %v479_v39 = vsel %vm478_vm15, %v473_v37, %v476_v36  ;;  %v474_v40 = vsel %vm158_vm4, %v471_v32, %v473_v37  ;;  %vm595_vm4 = vcmask 162816   ;;  %v971_v32 = vld [vmem:[%s1736_s8 + $0x2] ss:$0 sm:$0xff] }
 0x3af   :  { %485 = vrot.lane.b32.xlu1 %v479_v39, %s1352_s14  ;;  %483 = vrot.lane.b32.xlu0 %v474_v40, %s1352_s14 }
 0x41d   :  { %v482_v41 = vpop.permute.xlu1 %481 }
 0x41e   :  { %v490_v42 = vsel %vm172_vm5, %v453_v26, %v482_v41  ;;  %v863_v41 = vld [vmem:[%s1740_s7 + $0x30] sm:$0xff] }
 0x41f   :  { %1168 = vmatmul.mubr.msk.f32.vlgmr.msra.gmra.mrb[2].mxu0 %vm179_vm6, %v490_v42  ;;  %v864_v42 = vld [vmem:[%s1740_s7 + $0x38] sm:$0xff] }
 0x420   :  { %1170 = vmatprep.mubr.msk.f32.mxu0 %vm1354_vm7, %v1351_v29 }
 0x421   :  { %v484_v43 = vpop.permute.xlu0 %483  ;;  %v486_v45 = vpop.permute.xlu1 %485 }
 0x422   :  { %v491_v44 = vsel %vm172_vm5, %v458_v30, %v484_v43  ;;  %v492_v46 = vsel %vm172_vm5, %v463_v35, %v486_v45  ;;  %v862_v30 = vld [vmem:[%s1740_s7 + $0x28] sm:$0xff]  ;;  %v1340_v43 = vpack.c.bf16 %v864_v42, %v863_v41 }
 0x423   :  { %1171 = vmatmul.mubr.msk.f32.gmra.mrb[4].mxu0 %vm179_vm6, %v491_v44  ;;  %v1337_v33 = vpack.c.bf16 %v862_v30, %v861_v28 }
 0x424   :  { %1173 = vmatprep.mubr.msk.f32.mxu0 %vm1354_vm7, %v1351_v29 }
 0x427   :  { %1174 = vmatmul.mubr.msk.f32.gmra.mrb[6].mxu0 %vm179_vm6, %v492_v46  ;;  %v976_v46 = vld [vmem:[%s1736_s8 + $0x4] ss:$0 sm:$0xff] }
 0x428   :  { %1182 = vmatprep.mubr.msk.f32.mxu0 %vm1354_vm7, %v1351_v29 }
 0x4f2   :  { %v572_v49 = vpop.f32.mrb[2].mxu0 }
 0x4f3   :  { %v1169_v50 = vpop.f32.mrb[3].mxu0  ;;  %v573_v51 = vadd.f32 %v965_v48, %v572_v49 }
 0x4f5   :  { %v586_v56 = vmax.f32 %v573_v51, 0.0 }
 0x4f6   :  { %v577_v53 = vpop.f32.mrb[4].mxu0 }
 0x4f7   :  { %v578_v54 = vadd.f32 %v965_v48, %v577_v53  ;;  %v1172_v55 = vpop.f32.mrb[5].mxu0 }
 0x4f9   :  { %v587_v59 = vmax.f32 %v578_v54, 0.0 }
 0x4fa   :  { %v582_v60 = vpop.f32.mrb[6].mxu0 }
 0x4fb   :  { %v1310_v61 = vpack.c.bf16 %v587_v59, %v586_v56  ;;  %v583_v58 = vadd.f32 %v965_v48, %v582_v60  ;;  %v1175_v62 = vpop.f32.mrb[7].mxu0 }
 0x4fd   :  { %1311 = vmatpush3.bf16.msra.mxu0 %v1310_v61  ;;  %v588_v63 = vmax.f32 %v583_v58, 0.0 }
 0x4fe   :  { %1180 = vmatprep.subr.mxu0 %v1351_v29 }
 0x501   :  { %1181 = vmatpush3.msk.msra.mxu0 %vm77_vm0, %v588_v63 }
 0x502   :  { %1183 = vmatmul.mubr.msk.f32.vlgmr.msra.gmra.mrb[8].mxu0 %vm595_vm4, %v594_v0  ;;  %1185 = vmatprep.subr.mxu0 %v1351_v29 }
 0x503   :  { %1186 = vmatpush3.msk.msra.mxu0 %vm77_vm0, %v673_v1  ;;  %1187 = vmatprep.mubr.msk.f32.mxu0 %vm1354_vm7, %v1351_v29  ;;  %vm783_vm0 = vcmask 785408  }
 0x504   :  { %1330 = vmatprep.subr.bf16.mxu0 %v1353_v57 }
 0x506   :  { %1188 = vmatmul.mubr.msk.f32.vlgmr.msra.gmra.mrb[10].mxu0 %vm679_vm8, %v672_v27 }
 0x507   :  { %1233 = vmatprep.mubr.msk.f32.mxu0 %vm1354_vm7, %v1351_v29  ;;  %v770_v29 = vld [vmem:[%s1739_s6 + $0x20] sm:$0xff]  ;;  %1332 = vmatpush3.bf16.msra.mxu0 %v1331_v22 }
 0x508   :  { %v1319_v9 = vpack.c.bf16 %v771_v8, %v770_v29  ;;  %1333 = vmatprep.subr.bf16.mxu0 %v1353_v57 }
 0x50a   :  { %1320 = vmatpush3.bf16.msra.mxu1 %v1319_v9 }
 0x50b   :  { %1321 = vmatprep.subr.bf16.mxu1 %v1353_v57  ;;  %1335 = vmatpush3.bf16.msra.mxu0 %v1334_v25 }
 0x50c   :  { %1336 = vmatprep.subr.bf16.mxu0 %v1353_v57 }
 0x50e   :  { %1323 = vmatpush3.bf16.msra.mxu1 %v1322_v12 }
 0x50f   :  { %1324 = vmatprep.subr.bf16.mxu1 %v1353_v57  ;;  %1338 = vmatpush3.bf16.msra.mxu0 %v1337_v33 }
 0x510   :  { %1339 = vmatprep.subr.bf16.mxu0 %v1353_v57 }
 0x512   :  { %1326 = vmatpush3.bf16.msra.mxu1 %v1325_v15 }
 0x513   :  { %1327 = vmatprep.subr.bf16.mxu1 %v1353_v57  ;;  %1341 = vmatpush3.bf16.msra.mxu0 %v1340_v43  ;;  %v974_v57 = vld [vmem:[%s1736_s8 + $0x3] ss:$0 sm:$0xff] }
 0x516   :  { %1329 = vmatpush3.bf16.msra.mxu1 %v1328_v18 }
 0x5d5   :  { %v668_v26 = vpop.f32.mrb[8].mxu0 }
 0x5d6   :  { %757 = vrot.lane.b32.xlu0 %v668_v26, %s1352_s14  ;;  %v1184_v31 = vpop.f32.mrb[9].mxu0 }
 0x5d9   :  { %v752_v34 = vpop.f32.mrb[10].mxu0 }
 0x5da   :  { %v753_v35 = vadd.f32 %v971_v32, %v752_v34  ;;  %v1189_v36 = vpop.f32.mrb[11].mxu0 }
 0x5dc   :  { %761 = vrot.lane.b32.xlu1 %v753_v35, %s1355_s23 }
 0x648   :  { %v758_v37 = vpop.permute.xlu0 %757 }
 0x649   :  { %v764_v38 = vsel %vm172_vm5, %v1606_v24, %v758_v37  ;;  %vm943_vm5 = vcmask 1024  }
 0x64e   :  { %v762_v39 = vpop.permute.xlu1 %761 }
 0x64f   :  { %v765_v40 = vsel %vm179_vm6, %v764_v38, %v762_v39 }
 0x650   :  { %1215 = vmatmul.mubr.msk.f32.vlgmr.msra.gmra.mrb[10].mxu1 %vm783_vm0, %v765_v40 }
 0x723   :  { %v853_v44 = vpop.f32.mrb[10].mxu1 }
 0x724   :  { %v854_v24 = vadd.f32 %v974_v57, %v853_v44  ;;  %v1216_v45 = vpop.f32.mrb[11].mxu1 }
 0x726   :  { %1234 = vmatmul.mubr.msk.f32.vlgmr.msra.gmra.mrb[12].mxu0 %vm179_vm6, %v854_v24 }
 0x7f9   :  { %v939_v47 = vpop.f32.mrb[12].mxu0 }
 0x7fa   :  { %v940_v48 = vadd.f32 %v976_v46, %v939_v47  ;;  %v1235_v49 = vpop.f32.mrb[13].mxu0 }
 0x7fc   :  { %944 = vst.msk [vmem:[%s1741_s9] sm:$0x3] %vm943_vm5, %v940_v48 }

</bundles_post_ra>
